<compile_context>
chip_gen: v5e
topology: v5e:2x2
jax: 0.10.0
libtpu: 0.0.40
codegen_flags: <defaults>
</compile_context>

<pallas_src>
import functools

import jax
import jax.numpy as jnp
from jax import lax
from jax.experimental import pallas as pl
from jax.experimental.pallas import tpu as pltpu


_BIG = 1e30  # sentinel >> any realistic (squared) distance, << f32 overflow


# ----------------------------------------------------------------------------
# In-kernel helpers
# ----------------------------------------------------------------------------
def _block_dist_and_masks(feats_blk, feats_all_t, sq_col_blk, sq_row,
                          lbl_col_blk, lbl_row, row0, block_m, squared):
    """(TM, B) distances of this anchor block vs. the whole batch + masks."""
    tm = block_m
    B = feats_all_t.shape[1]

    # MXU: bf16 x bf16 -> f32 accumulation; the resident full-batch operand is
    # already (D, B), so this is a plain NN contraction.
    dot = jnp.dot(feats_blk, feats_all_t, preferred_element_type=jnp.float32)

    # ||a||^2 - 2 a.b + ||b||^2 (norms precomputed from the same quantized feats).
    dist = sq_row - 2.0 * dot + sq_col_blk
    dist = jnp.maximum(dist, 0.0)
    if not squared:
        zmask = dist == 0.0
        dist = jnp.sqrt(dist + jnp.where(zmask, 1e-8, 0.0))
        dist = jnp.where(zmask, 0.0, dist)

    # Global "i == j" mask for this anchor block.
    row_g = row0 + lax.broadcasted_iota(jnp.int32, (tm, B), 0)
    col_g = lax.broadcasted_iota(jnp.int32, (tm, B), 1)
    eye = row_g == col_g

    lbl_eq = lbl_col_blk == lbl_row                  # (TM, B)
    return dist, lbl_eq, eye


# ----------------------------------------------------------------------------
# Kernels (one anchor-row block per grid step; partial sums to SMEM)
# ----------------------------------------------------------------------------
def _triplet_batch_hard_kernel(feats_blk_ref, feats_t_ref, sq_col_ref, sq_row_ref,
                               lbl_col_ref, lbl_row_ref, out_ref,
                               *, margin, squared, block_m):
    row0 = pl.multiple_of(pl.program_id(0) * block_m, block_m)
    sq_col_blk = sq_col_ref[pl.ds(row0, block_m), :]       # (TM,1) f32 (resident)
    lbl_col_blk = lbl_col_ref[pl.ds(row0, block_m), :]     # (TM,1) i32 (resident)

    dist, lbl_eq, eye = _block_dist_and_masks(
        feats_blk_ref[...], feats_t_ref[...], sq_col_blk, sq_row_ref[...],
        lbl_col_blk, lbl_row_ref[...], row0, block_m, squared)

    # Hardest positive: one masked max reduce.
    ap_mask = jnp.logical_and(lbl_eq, jnp.logical_not(eye))
    hardest_pos = jnp.max(jnp.where(ap_mask, dist, 0.0), axis=1, keepdims=True)

    # Hardest negative: one masked min reduce (no max_dist reduce needed).
    hn_neg = jnp.min(jnp.where(lbl_eq, _BIG, dist), axis=1, keepdims=True)
    # Degenerate row with zero negatives (all labels equal): PyTorch's
    # dist + max_dist*(1-mask_an) formula reduces to max_dist, which equals the
    # hardest positive there (dist[i,i] == 0), so fall back to it.
    hardest_neg = jnp.where(hn_neg > 0.5 * _BIG, hardest_pos, hn_neg)

    loss = jnp.maximum(hardest_pos - hardest_neg + margin, 0.0)
    out_ref[0, 0] = jnp.sum(loss)                 # partial numerator
    out_ref[0, 1] = jnp.float32(block_m)          # number of anchors in block


def _triplet_batch_all_kernel(feats_blk_ref, feats_t_ref, sq_col_ref, sq_row_ref,
                              lbl_col_ref, lbl_row_ref, out_ref,
                              *, margin, squared, block_m, block_k):
    row0 = pl.multiple_of(pl.program_id(0) * block_m, block_m)
    sq_col_blk = sq_col_ref[pl.ds(row0, block_m), :]
    lbl_col_blk = lbl_col_ref[pl.ds(row0, block_m), :]

    dist, lbl_eq, eye = _block_dist_and_masks(
        feats_blk_ref[...], feats_t_ref[...], sq_col_blk, sq_row_ref[...],
        lbl_col_blk, lbl_row_ref[...], row0, block_m, squared)

    B = dist.shape[1]
    # Fold margin + both masks into the (TM,B) precompute.  The original mask
    # (i!=j & i!=k & j!=k & lbl_i==lbl_j & lbl_i!=lbl_k) factors as
    # mask_ap(i,j) * mask_an(i,k): lbl_i!=lbl_k implies i!=k and j!=k.
    d_ap_eff = jnp.where(jnp.logical_and(lbl_eq, jnp.logical_not(eye)),
                         dist + margin, -_BIG)          # positives j on lanes
    d_an_eff = jnp.where(lbl_eq, _BIG, dist)            # negatives k

    d_ap_3d = d_ap_eff[:, None, :]                      # (TM, 1, B)

    def chunk_sums(an_chunk):
        # slab = relu(d_ap_eff - d_an_eff): masked entries are forced negative.
        slab = jnp.maximum(d_ap_3d - an_chunk[:, :, None], 0.0)   # (TM, tk, B)
        s = jnp.sum(slab)
        c = jnp.sum(jnp.where(slab > 1e-10, 1.0, 0.0))
        return s, c

    nchunks = B // block_k                               # block_k divides B
    if nchunks <= 1:
        loss_sum, valid_cnt = chunk_sums(d_an_eff)
    else:
        def body(c, carry):
            ls, vc = carry
            k0 = pl.multiple_of(c * block_k, block_k)
            an_chunk = lax.dynamic_slice_in_dim(d_an_eff, k0, block_k, axis=1)
            s, n = chunk_sums(an_chunk)
            return ls + s, vc + n

        loss_sum, valid_cnt = lax.fori_loop(
            0, nchunks, body, (jnp.float32(0.0), jnp.float32(0.0)), unroll=2)

    out_ref[0, 0] = loss_sum                     # partial numerator
    out_ref[0, 1] = valid_cnt                    # partial valid-triplet count


# ----------------------------------------------------------------------------
# Wrapper
# ----------------------------------------------------------------------------
def _largest_divisor(n, cap, mult):
    """Largest multiple of `mult` <= cap that divides n, else n itself."""
    b = min(cap, n)
    b -= b % mult
    while b >= mult:
        if n % b == 0:
            return b
        b -= mult
    return n


def _vmem_capacity_bytes():
    try:
        return int(pltpu.get_tpu_info().vmem_capacity_bytes)
    except Exception:
        return 64 * 1024 * 1024   # conservative default (v7x per-TC VMEM)


def triplet_loss(feats, labels, *, margin, strategy="batch_hard", squared=True,
                 matmul_dtype=jnp.bfloat16, block_m=None, block_k=128):
    """Pallas implementation of TripletLoss.forward(feats, labels)."""
    if strategy not in ("batch_hard", "batch_all"):
        raise RuntimeError("Strategy must be 'batch_hard' or 'batch_all'")

    B, D = feats.shape

    # bf16 operands for the MXU; zero-pad the contraction dim to a lane
    # multiple (does not change distances) so the wide MXU is fed properly.
    feats_mm = feats.astype(matmul_dtype)
    D_pad = max(128, ((D + 127) // 128) * 128)
    if D_pad != D:
        feats_mm = jnp.pad(feats_mm, ((0, 0), (0, D_pad - D)))
    feats_mm_t = feats_mm.T                      # (D_pad, B): transposed once in XLA

    # Squared norms computed ONCE from the SAME quantized values so dist(i,i)
    # stays ~0 (no f32/bf16 cancellation skew).
    f32q = feats_mm.astype(jnp.float32)
    sq = jnp.sum(f32q * f32q, axis=-1)
    sq_row = sq.reshape(1, B)
    sq_col = sq.reshape(B, 1)

    lbl = labels.astype(jnp.int32)
    lbl_row = lbl.reshape(1, B)
    lbl_col = lbl.reshape(B, 1)

    if block_m is None:
        if strategy == "batch_hard":
            cap = 128
            if B >= 16:                           # keep >= 2 blocks for v7x megacore
                half = max(8, (B // 2) - ((B // 2) % 8))
                cap = min(cap, half)
            block_m = _largest_divisor(B, cap, 8)
        else:
            block_m = _largest_divisor(B, 8, 8)   # keep the 3-D slab small
    nblk = max(1, B // block_m)
    block_k = _largest_divisor(B, min(block_k, B), 8)

    if strategy == "batch_hard":
        kernel = functools.partial(_triplet_batch_hard_kernel,
                                   margin=float(margin), squared=squared,
                                   block_m=block_m)
        slab_bytes = 0
    else:
        kernel = functools.partial(_triplet_batch_all_kernel,
                                   margin=float(margin), squared=squared,
                                   block_m=block_m, block_k=block_k)
        slab_bytes = block_m * block_k * B * 4

    # Generation-aware VMEM budget with compiler headroom.
    itemsize = jnp.dtype(matmul_dtype).itemsize
    est = (4 * block_m * D_pad * itemsize        # anchor block (double buffered)
           + 2 * D_pad * B * itemsize            # resident transposed batch
           + 16 * block_m * B * 4                # (TM,B) f32 temporaries
           + 3 * slab_bytes                      # batch_all slab(s)
           + (2 << 20))
    cap_bytes = _vmem_capacity_bytes()
    vmem_limit = int(min(int(0.85 * cap_bytes), max(16 * 1024 * 1024, est)))

    smem = pltpu.MemorySpace.SMEM
    grid_spec = pltpu.PrefetchScalarGridSpec(
        num_scalar_prefetch=0,
        grid=(nblk,),
        in_specs=[
            pl.BlockSpec((block_m, D_pad), lambda i: (i, 0)),   # anchor rows (bf16)
            pl.BlockSpec((D_pad, B), lambda i: (0, 0)),         # full batch^T (resident)
            pl.BlockSpec((B, 1), lambda i: (0, 0)),             # ||x||^2 col (resident)
            pl.BlockSpec((1, B), lambda i: (0, 0)),             # ||x||^2 row (resident)
            pl.BlockSpec((B, 1), lambda i: (0, 0)),             # labels col (resident)
            pl.BlockSpec((1, B), lambda i: (0, 0)),             # labels row (resident)
        ],
        out_specs=pl.BlockSpec((1, 2), lambda i: (i, 0), memory_space=smem),
    )

    partials = pl.pallas_call(
        kernel,
        out_shape=jax.ShapeDtypeStruct((nblk, 2), jnp.float32),
        grid_spec=grid_spec,
        compiler_params=pltpu.CompilerParams(
            dimension_semantics=("parallel",),      # anchor blocks are independent
            vmem_limit_bytes=vmem_limit),
    )(feats_mm, feats_mm_t, sq_col, sq_row, lbl_col, lbl_row)

    num = jnp.sum(partials[:, 0])
    den = jnp.sum(partials[:, 1])
    if strategy == "batch_hard":
        return num / den                       # mean over all B anchors
    return num / (den + 1e-10)                 # batch_all denominator
    # TODO(synk): optionally add an f32 (bf16x3) matmul path for bit-closer
    # parity with an f32 PyTorch reference.


# ----------------------------------------------------------------------------
# Pure-JAX reference (mirrors the PyTorch module semantics exactly)
# ----------------------------------------------------------------------------
def _ref_dist_mat(feats, squared):
    dot = feats @ feats.T
    sq = jnp.diag(dot)
    d = sq[None, :] - 2.0 * dot + sq[:, None]
    d = jnp.maximum(d, 0.0)
    if not squared:
        m = (d == 0.0).astype(jnp.float32)
        d = jnp.sqrt(d + m * 1e-8) * (1.0 - m)
    return d


def _ref_triplet_loss(feats, labels, margin, strategy, squared):
    d = _ref_dist_mat(feats.astype(jnp.float32), squared)
    B = labels.shape[0]
    eye = jnp.eye(B, dtype=bool)
    lbl_eq = labels[None, :] == labels[:, None]
    if strategy == "batch_hard":
        mp = (lbl_eq & ~eye).astype(jnp.float32)
        mn = (~lbl_eq).astype(jnp.float32)
        hp = jnp.max(d * mp, axis=1)
        md = jnp.max(d, axis=1, keepdims=True)
        hn = jnp.min(d + md * (1.0 - mn), axis=1)
        return jnp.mean(jnp.maximum(hp - hn + margin, 0.0))
    else:
        ne = ~eye
        mask = (ne[:, :, None] & ne[:, None, :] & ne[None, :, :]
                & lbl_eq[:, :, None] & (~lbl_eq)[:, None, :]).astype(jnp.float32)
        loss = jnp.maximum((d[:, :, None] - d[:, None, :] + margin) * mask, 0.0)
        nvalid = jnp.sum((loss > 1e-10).astype(jnp.float32))
        return jnp.sum(loss) / (nvalid + 1e-10)


# ----------------------------------------------------------------------------
if __name__ == "__main__":
    key = jax.random.PRNGKey(0)
    kf, kl = jax.random.split(key)

    B, D = 8, 32
    MARGIN = 0.3  # module __init__ argument (registered as a buffer)
    feats = jax.random.normal(kf, (B, D), dtype=jnp.float32)
    labels = jax.random.randint(kl, (B,), 0, 3, dtype=jnp.int32)

    # default module config: strategy='batch_hard', squared=True
    loss_hard = triplet_loss(feats, labels, margin=MARGIN,
                             strategy="batch_hard", squared=True)
    # also exercise the 'batch_all' / non-squared path
    loss_all = triplet_loss(feats, labels, margin=MARGIN,
                            strategy="batch_all", squared=False)
    jax.block_until_ready((loss_hard, loss_all))

    # Reference on the same bf16-quantized embeddings the kernel's MXU consumes.
    feats_q = feats.astype(jnp.bfloat16).astype(jnp.float32)
    ref_hard = _ref_triplet_loss(feats_q, labels, MARGIN, "batch_hard", True)
    ref_all = _ref_triplet_loss(feats_q, labels, MARGIN, "batch_all", False)
    assert jnp.allclose(loss_hard, ref_hard, rtol=1e-3, atol=1e-3), (loss_hard, ref_hard)
    assert jnp.allclose(loss_all, ref_all, rtol=1e-3, atol=1e-3), (loss_all, ref_all)

    print("KERNEL_OK")
</pallas_src>

<mosaic_0001>
module attributes {stable_mosaic.version = 11 : i64} {
  func.func @_triplet_batch_hard_kernel(%arg0: i32, %arg1: memref<8x128xbf16, #tpu.memory_space<vmem>>, %arg2: memref<128x8xbf16, #tpu.memory_space<vmem>>, %arg3: memref<8x1xf32, #tpu.memory_space<vmem>>, %arg4: memref<1x8xf32, #tpu.memory_space<vmem>>, %arg5: memref<8x1xi32, #tpu.memory_space<vmem>>, %arg6: memref<1x8xi32, #tpu.memory_space<vmem>>, %arg7: memref<1x2xf32, #tpu.memory_space<smem>>) attributes {dimension_semantics = [#tpu.dimension_semantics<parallel>], iteration_bounds = array<i64: 1>, scalar_prefetch = 0 : i64, scratch_operands = 0 : i64, tpu.core_type = #tpu.core_type<tc>, window_params = [{transform_indices = @transform_0, window_bounds = array<i64: 8, 128>}, {pipeline_mode = #tpu.pipeline_mode<synchronous>, transform_indices = @transform_1, window_bounds = array<i64: 128, 8>}, {pipeline_mode = #tpu.pipeline_mode<synchronous>, transform_indices = @transform_2, window_bounds = array<i64: 8, 1>}, {pipeline_mode = #tpu.pipeline_mode<synchronous>, transform_indices = @transform_3, window_bounds = array<i64: 1, 8>}, {pipeline_mode = #tpu.pipeline_mode<synchronous>, transform_indices = @transform_4, window_bounds = array<i64: 8, 1>}, {pipeline_mode = #tpu.pipeline_mode<synchronous>, transform_indices = @transform_5, window_bounds = array<i64: 1, 8>}, {transform_indices = @transform_6, window_bounds = array<i64: 1, 2>}]} {
    %c8_i32 = arith.constant 8 : i32
    %0 = arith.muli %arg0, %c8_i32 : i32
    %1 = tpu.assume_multiple %0, 8 : i32
    %2 = arith.index_cast %1 : i32 to index
    %c0 = arith.constant 0 : index
    %3 = vector.load %arg3[%2, %c0] : memref<8x1xf32, #tpu.memory_space<vmem>>, vector<8x1xf32>
    %4 = arith.index_cast %1 : i32 to index
    %c0_0 = arith.constant 0 : index
    %5 = vector.load %arg5[%4, %c0_0] : memref<8x1xi32, #tpu.memory_space<vmem>>, vector<8x1xi32>
    %c0_1 = arith.constant 0 : index
    %c0_2 = arith.constant 0 : index
    %6 = vector.load %arg1[%c0_1, %c0_2] : memref<8x128xbf16, #tpu.memory_space<vmem>>, vector<8x128xbf16>
    %c0_3 = arith.constant 0 : index
    %c0_4 = arith.constant 0 : index
    %7 = vector.load %arg2[%c0_3, %c0_4] : memref<128x8xbf16, #tpu.memory_space<vmem>>, vector<128x8xbf16>
    %c0_5 = arith.constant 0 : index
    %c0_6 = arith.constant 0 : index
    %8 = vector.load %arg4[%c0_5, %c0_6] : memref<1x8xf32, #tpu.memory_space<vmem>>, vector<1x8xf32>
    %c0_7 = arith.constant 0 : index
    %c0_8 = arith.constant 0 : index
    %9 = vector.load %arg6[%c0_7, %c0_8] : memref<1x8xi32, #tpu.memory_space<vmem>>, vector<1x8xi32>
    %cst = arith.constant dense<0.000000e+00> : vector<8x8xf32>
    %10 = tpu.matmul %6, %7, %cst {dimension_numbers = #tpu.dot_dimension_numbers<[1], [0], [0], [1], [0, 0, 1, 1], [], []>} : vector<8x128xbf16>, vector<128x8xbf16>, vector<8x8xf32> -> vector<8x8xf32>
    %cst_9 = arith.constant 2.000000e+00 : f32
    %11 = vector.broadcast %cst_9 : f32 to vector<8x8xf32>
    %12 = arith.mulf %11, %10 : vector<8x8xf32>
    %13 = vector.broadcast %8 : vector<1x8xf32> to vector<8x8xf32>
    %14 = arith.subf %13, %12 : vector<8x8xf32>
    %15 = vector.broadcast %3 : vector<8x1xf32> to vector<8x8xf32>
    %16 = arith.addf %14, %15 : vector<8x8xf32>
    %cst_10 = arith.constant 0.000000e+00 : f32
    %17 = vector.broadcast %cst_10 : f32 to vector<8x8xf32>
    %18 = arith.maximumf %16, %17 : vector<8x8xf32>
    %19 = tpu.iota {dimensions = array<i32: 0>} : vector<8x8xi32>
    %20 = vector.broadcast %1 : i32 to vector<8x8xi32>
    %21 = arith.addi %20, %19 : vector<8x8xi32>
    %22 = tpu.iota {dimensions = array<i32: 1>} : vector<8x8xi32>
    %23 = arith.cmpi eq, %21, %22 : vector<8x8xi32>
    %24 = vector.broadcast %5 : vector<8x1xi32> to vector<8x8xi32>
    %25 = vector.broadcast %9 : vector<1x8xi32> to vector<8x8xi32>
    %26 = arith.cmpi eq, %24, %25 : vector<8x8xi32>
    %cst_11 = arith.constant dense<true> : vector<8x8xi1>
    %27 = arith.xori %23, %cst_11 : vector<8x8xi1>
    %28 = arith.andi %26, %27 : vector<8x8xi1>
    %cst_12 = arith.constant 0.000000e+00 : f32
    %29 = vector.broadcast %cst_12 : f32 to vector<8x8xf32>
    %30 = arith.select %28, %18, %29 : vector<8x8xi1>, vector<8x8xf32>
    %cst_13 = arith.constant dense<0xFF800000> : vector<8xf32>
    %31 = vector.multi_reduction <maximumf>, %30, %cst_13 [1] : vector<8x8xf32> to vector<8xf32>
    %32 = vector.shape_cast %31 : vector<8xf32> to vector<8x1xf32>
    %cst_14 = arith.constant 1.000000e+30 : f32
    %33 = vector.broadcast %cst_14 : f32 to vector<8x8xf32>
    %34 = arith.select %26, %33, %18 : vector<8x8xi1>, vector<8x8xf32>
    %cst_15 = arith.constant dense<0x7F800000> : vector<8xf32>
    %35 = vector.multi_reduction <minimumf>, %34, %cst_15 [1] : vector<8x8xf32> to vector<8xf32>
    %36 = vector.shape_cast %35 : vector<8xf32> to vector<8x1xf32>
    %cst_16 = arith.constant 5.000000e+29 : f32
    %37 = vector.broadcast %cst_16 : f32 to vector<8x1xf32>
    %38 = arith.cmpf ogt, %36, %37 : vector<8x1xf32>
    %39 = arith.select %38, %32, %36 : vector<8x1xi1>, vector<8x1xf32>
    %40 = arith.subf %32, %39 : vector<8x1xf32>
    %cst_17 = arith.constant 3.000000e-01 : f32
    %41 = vector.broadcast %cst_17 : f32 to vector<8x1xf32>
    %42 = arith.addf %40, %41 : vector<8x1xf32>
    %cst_18 = arith.constant 0.000000e+00 : f32
    %43 = vector.broadcast %cst_18 : f32 to vector<8x1xf32>
    %44 = arith.maximumf %42, %43 : vector<8x1xf32>
    %45 = vector.shape_cast %44 : vector<8x1xf32> to vector<1x8x1xf32>
    %cst_19 = arith.constant dense<0.000000e+00> : vector<1xf32>
    %46 = vector.multi_reduction <add>, %45, %cst_19 [1, 2] : vector<1x8x1xf32> to vector<1xf32>
    %47 = vector.shape_cast %46 : vector<1xf32> to vector<1x1x1xf32>
    %48 = vector.extract %47[0, 0, 0] : f32 from vector<1x1x1xf32>
    %c0_20 = arith.constant 0 : index
    %c0_21 = arith.constant 0 : index
    %49 = memref.load %arg7[%c0_20, %c0_21] : memref<1x2xf32, #tpu.memory_space<smem>>
    memref.store %48, %arg7[%c0_20, %c0_21] : memref<1x2xf32, #tpu.memory_space<smem>>
    %cst_22 = arith.constant 8.000000e+00 : f32
    %c0_23 = arith.constant 0 : index
    %c1 = arith.constant 1 : index
    %50 = memref.load %arg7[%c0_23, %c1] : memref<1x2xf32, #tpu.memory_space<smem>>
    memref.store %cst_22, %arg7[%c0_23, %c1] : memref<1x2xf32, #tpu.memory_space<smem>>
    return
  }
  func.func @transform_0(%arg0: i32) -> (i32, i32) {
    %c0_i32 = arith.constant 0 : i32
    %c0_i32_0 = arith.constant 0 : i32
    return %arg0, %c0_i32 : i32, i32
  }
  func.func @transform_1(%arg0: i32) -> (i32, i32) {
    %c0_i32 = arith.constant 0 : i32
    %c0_i32_0 = arith.constant 0 : i32
    %c0_i32_1 = arith.constant 0 : i32
    return %c0_i32, %c0_i32_0 : i32, i32
  }
  func.func @transform_2(%arg0: i32) -> (i32, i32) {
    %c0_i32 = arith.constant 0 : i32
    %c0_i32_0 = arith.constant 0 : i32
    %c0_i32_1 = arith.constant 0 : i32
    return %c0_i32, %c0_i32_0 : i32, i32
  }
  func.func @transform_3(%arg0: i32) -> (i32, i32) {
    %c0_i32 = arith.constant 0 : i32
    %c0_i32_0 = arith.constant 0 : i32
    %c0_i32_1 = arith.constant 0 : i32
    return %c0_i32, %c0_i32_0 : i32, i32
  }
  func.func @transform_4(%arg0: i32) -> (i32, i32) {
    %c0_i32 = arith.constant 0 : i32
    %c0_i32_0 = arith.constant 0 : i32
    %c0_i32_1 = arith.constant 0 : i32
    return %c0_i32, %c0_i32_0 : i32, i32
  }
  func.func @transform_5(%arg0: i32) -> (i32, i32) {
    %c0_i32 = arith.constant 0 : i32
    %c0_i32_0 = arith.constant 0 : i32
    %c0_i32_1 = arith.constant 0 : i32
    return %c0_i32, %c0_i32_0 : i32, i32
  }
  func.func @transform_6(%arg0: i32) -> (i32, i32) {
    %c0_i32 = arith.constant 0 : i32
    %c0_i32_0 = arith.constant 0 : i32
    return %arg0, %c0_i32 : i32, i32
  }
}

</mosaic_0001>

<bundles_post_ra>
// kernel: tpu_custom_call.1
= control target key start
LH: loop header
LB: loop body
LE: loop exit
PB: predicated region body
PF: predicated region fallthrough
CT: control target
= control target key end

     0   :  { %v242_v2 = vmov 0   ;;  %s323_s0 = inlined_call_operand.vmem [shape: bf16[8,128], index: 0, kind: input, shape index: {}]   ;;  %s324_s1 = inlined_call_operand.vmem [shape: bf16[128,8], index: 1, kind: input, shape index: {}]   ;;  %s325_s2 = inlined_call_operand.vmem [shape: f32[8,1], index: 2, kind: input, shape index: {}]   ;;  %s326_s3 = inlined_call_operand.vmem [shape: f32[1,8], index: 3, kind: input, shape index: {}]   ;;  %s327_s4 = inlined_call_operand.vmem [shape: s32[8,1], index: 4, kind: input, shape index: {}]   ;;  %s328_s5 = inlined_call_operand.vmem [shape: s32[1,8], index: 5, kind: input, shape index: {}]   ;;  %s329_s6 = inlined_call_operand.hbm [shape: f32[1,2], index: 6, kind: output, shape index: {}]  }
   0x1   :  { %v218_v0 = vld [vmem:[%s324_s1 + $0x38] sm:$0xff]  ;;  %v217_v1 = vld [vmem:[%s324_s1 + $0x30] sm:$0xff]  ;;  %225 = vset.pattern.permute.xlu0 %v242_v2  ;;  %v26_v3 = vld [vmem:[%s325_s2] sm:$0xff] }
   0x2   :  { %96 = vmatpush.bf16.msra.mxu0 %v218_v0  ;;  %116 = vperm.xlu0 %225, %v26_v3  }
   0x3   :  { %11 = vsyncpa [#allocation3], 0  ;;  %v216_v4 = vld [vmem:[%s324_s1 + $0x28] sm:$0xff]  ;;  %v28_v5 = vld [vmem:[%s327_s4] sm:$0xff]  ;;  %v121_v14 = vlaneseq  ;;  %vm136_vm0 = vcmask 64512   ;;  %vm243_vm3 = vmmov 1  }
   0x4   :  { %v215_v6 = vld [vmem:[%s324_s1 + $0x20] sm:$0xff]  ;;  %v214_v7 = vld [vmem:[%s324_s1 + $0x18] sm:$0xff]  ;;  %v213_v8 = vld [vmem:[%s324_s1 + $0x10] sm:$0xff]  ;;  %vm149_vm7 = vcmask 7168   ;;  %s245_s22 = smov [#allocation2]  }
   0x5   :  { %v212_v9 = vld [vmem:[%s324_s1 + $0x8] sm:$0xff]  ;;  %v211_v10 = vld [vmem:[%s324_s1] sm:$0xff]  ;;  %v122_v18 = vshrl.u32 %v121_v14, 7  ;;  %v126_v19 = vand.u32 127, %v121_v14 }
   0x6   :  { %97 = vmatpush.bf16.msra.mxu0 %v217_v1  ;;  %v29_v11 = vld [vmem:[%s323_s0] sm:$0xf]  ;;  %s244_s0 = smov 8.0  }
   0x7   :  { %v227_v13 = vld [vmem:[%s326_s3] ss:$0 sm:$0xff]  ;;  %vm127_vm1 = vcmp.eq.s32.totalorder %v122_v18, %v126_v19  ;;  %163 = sst [smem:[#allocation2 + $0x1]] %s244_s0 }
   0x8   :  { %v226_v20 = vld [vmem:[%s328_s5] ss:$0 sm:$0xff]  ;;  %vm133_vm4 = vmxor %vm127_vm1, %vm243_vm3  ;;  %s169_s5 = sshll.u32 %s329_s6, 4  ;;  %s170_s5 = int_to_ptr.hbm [resolvable:$true] %s169_s5 }
   0xa   :  { %98 = vmatpush.bf16.msra.mxu0 %v216_v4  ;;  %129 = vperm.xlu0 %225, %v28_v5  }
   0xe   :  { %99 = vmatpush.bf16.msra.mxu0 %v215_v6 }
  0x12   :  { %100 = vmatpush.bf16.msra.mxu0 %v214_v7 }
  0x16   :  { %101 = vmatpush.bf16.msra.mxu0 %v213_v8 }
  0x1a   :  { %102 = vmatpush.bf16.msra.mxu0 %v212_v9 }
  0x1e   :  { %103 = vmatpush.bf16.msra.mxu0 %v211_v10 }
  0x21   :  { %104 = vmatmul.bf16.vlgmr.msra.gmra.mxu0 %v29_v11 }
  0x74   :  { %v117_v12 = vpop.permute.xlu0 %116 }
  0x7c   :  { %v130_v21 = vpop.permute.xlu0 %129 }
  0x7d   :  { %vm132_vm2 = vcmp.eq.s32.totalorder %v130_v21, %v226_v20 }
  0x7e   :  { %vm134_vm5 = vmand %vm132_vm2, %vm133_vm4 }
  0x9e   :  { %v105_v15 = vpop.f32.mrf.mxu0 }
  0x9f   :  { %v109_v16 = vmul.f32 2.0, %v105_v15 }
  0xa1   :  { %v113_v17 = vsub.f32 %v227_v13, %v109_v16 }
  0xa3   :  { %v119_v22 = vadd.f32 %v117_v12, %v113_v17 }
  0xa5   :  { %v120_v23 = vmax.f32 %v119_v22, 0.0 }
  0xa6   :  { %v107_v24 = vpop.f32.mrf.mxu0 }
  0xa7   :  { %v140_v25 = vsel %vm132_vm2, 1e+30, %v120_v23  ;;  %v135_v27 = vsel %vm134_vm5, %v120_v23, 0.0 }
  0xa8   :  { %v141_v26 = vsel %vm136_vm0, %v140_v25, inf  ;;  %v137_v28 = vsel %vm136_vm0, %v135_v27, -inf }
  0xa9   :  { %142 = vmin.xlane.f32.xlu1 %v141_v26 }
  0xb1   :  { %138 = vmax.xlane.f32.xlu1 %v137_v28 }
 0x11c   :  { %v143_v29 = vpop.xlane.xlu1 %142 }
 0x11d   :  { %vm144_vm6 = vcmp.gt.f32.partialorder %v143_v29, 5e+29 }
 0x124   :  { %v139_v30 = vpop.xlane.xlu1 %138 }
 0x125   :  { %v145_v31 = vsel %vm144_vm6, %v139_v30, %v143_v29 }
 0x126   :  { %v146_v32 = vsub.f32 %v139_v30, %v145_v31 }
 0x128   :  { %v147_v33 = vadd.f32 0.3, %v146_v32 }
 0x12a   :  { %v148_v34 = vmax.f32 %v147_v33, 0.0 }
 0x12c   :  { %v150_v35 = vsel %vm149_vm7, %v148_v34, 0.0 }
 0x12d   :  { %151 = vadd.xlane.f32.xlu2 %v150_v35 }
 0x1a0   :  { %v152_v36 = vpop.xlane.xlu2 %151 }
 0x1a1   :  { %v153_v37 = vrot.slane %v152_v36, 4 }
 0x1a3   :  { %v154_v38 = vadd.f32 %v153_v37, %v152_v36 }
 0x1a5   :  { %v155_v39 = vrot.slane %v154_v38, 2 }
 0x1a7   :  { %v156_v40 = vadd.f32 %v155_v39, %v154_v38 }
 0x1a9   :  { %v157_v41 = vrot.slane %v156_v40, 1 }
 0x1ab   :  { %v158_v42 = vadd.f32 %v157_v41, %v156_v40 }
 0x1ad   :  { %219 = vpush %v158_v42 }
 0x1de   :  { %s220_s21 = spop %219 }
 0x1df   :  { %161 = sst [smem:[#allocation2]] %s220_s21 }
 0x1e0   :  { %172 = dma.smem_to_hbm %s245_s22, 16, %s170_s5, [#allocation3]  }
 0x1e1   :  { %240 = dma.done.wait [#allocation3], 16  }
 0x1e2   :  { %241 = vsyncadd [#allocation3], 4294967280 }
 0x1e3   :  { %177 = sfence }
 0x1e4   :  { %178 = vsyncpa [#allocation3], 1 }

</bundles_post_ra>
